<compile_context>
chip_gen: v6e
topology: v6e:2x2x1
jax: 0.10.0
libtpu: 0.0.40
codegen_flags: <defaults>
</compile_context>

<pallas_src>
import functools

import jax
import jax.numpy as jnp
from jax.experimental import pallas as pl
from jax.experimental.pallas import tpu as pltpu

ACT_DTYPE = jnp.bfloat16  # inter-kernel activation dtype


@functools.lru_cache(maxsize=None)
def _vmem_limit():
    """Chip-aware scoped-VMEM limit: ~half of physical VMEM, capped at 96 MiB."""
    try:
        cap = pltpu.get_tpu_info().vmem_capacity_bytes
    except Exception:  # pragma: no cover - conservative fallback
        cap = 64 * 1024 * 1024
    return int(min(max(cap // 2, 32 * 1024 * 1024), 96 * 1024 * 1024))


def _round_up(x, m):
    return ((x + m - 1) // m) * m


def _row_tile(m, target=512):
    """Row tile: `target` rows when large (cdiv grid handles the remainder),
    otherwise the whole extent rounded up to a sublane multiple."""
    if m >= target:
        return target
    return max(8, _round_up(m, 8))


# ----------------------------- matmul kernels (1x1 conv / init conv) -----------------------------

def _mm_affine_kernel(x_ref, w_ref, s_ref, t_ref, o_ref, *, act):
    y = jnp.dot(x_ref[...], w_ref[...], preferred_element_type=jnp.float32)
    y = y * s_ref[...] + t_ref[...]
    if act == "relu":
        y = jnp.maximum(y, 0.0)
    o_ref[...] = y.astype(o_ref.dtype)


def _mm_plain_kernel(x_ref, w_ref, o_ref, *, act):
    y = jnp.dot(x_ref[...], w_ref[...], preferred_element_type=jnp.float32)
    if act == "relu":
        y = jnp.maximum(y, 0.0)
    o_ref[...] = y.astype(o_ref.dtype)


def matmul_act(x, w, scale=None, shift=None, act="none", out_dtype=ACT_DTYPE):
    """y = act((x @ w) [* scale + shift]); x:(M,K) bf16, w:(K,N) bf16.

    The full (K,N) weight (and scale/shift) use constant index maps so they are
    DMA'd once and stay VMEM-resident across the whole M sweep."""
    M, K = x.shape
    N = w.shape[1]
    TM = _row_tile(M)
    grid = (pl.cdiv(M, TM),)
    x_spec = pl.BlockSpec((TM, K), lambda i: (i, 0))
    w_spec = pl.BlockSpec((K, N), lambda i: (0, 0))
    o_spec = pl.BlockSpec((TM, N), lambda i: (i, 0))
    cp = pltpu.CompilerParams(dimension_semantics=("parallel",),
                              vmem_limit_bytes=_vmem_limit())
    if scale is None:   # skip identity affine epilogue entirely (Pw1)
        return pl.pallas_call(
            functools.partial(_mm_plain_kernel, act=act),
            out_shape=jax.ShapeDtypeStruct((M, N), out_dtype),
            grid=grid, in_specs=[x_spec, w_spec], out_specs=o_spec,
            compiler_params=cp,
        )(x, w)
    v_spec = pl.BlockSpec((1, N), lambda i: (0, 0))
    return pl.pallas_call(
        functools.partial(_mm_affine_kernel, act=act),
        out_shape=jax.ShapeDtypeStruct((M, N), out_dtype),
        grid=grid, in_specs=[x_spec, w_spec, v_spec, v_spec], out_specs=o_spec,
        compiler_params=cp,
    )(x, w, scale.reshape(1, N), shift.reshape(1, N))


# ----------------------------- depthwise 3x3 (in-kernel taps) -----------------------------

def _phase_split(x, stride):
    """Zero-pad (3x3 conv, pad=1) and split into stride^2 phase images so the
    depthwise kernel only needs unit-stride, static window reads."""
    N, H, W, C = x.shape
    s = stride
    Ho = (H - 1) // s + 1
    Wo = (W - 1) // s + 1
    ext = 2 // s
    Hph, Wph = Ho + ext, Wo + ext
    xpad = jnp.zeros((N, s * Hph, s * Wph, C), x.dtype)
    xpad = xpad.at[:, 1:H + 1, 1:W + 1, :].set(x)
    ph = xpad.reshape(N, Hph, s, Wph, s, C)
    ph = jnp.transpose(ph, (0, 2, 4, 1, 3, 5)).reshape(N * s * s, Hph, Wph, C)
    return ph, Ho, Wo, Hph, Wph


def _dw_kernel(ph_ref, w_ref, s_ref, t_ref, o_ref, *, stride, Ho, Wo, row_tile):
    """Depthwise 3x3 + BN + ReLU.

    The <=3*stride distinct column-offset windows are loaded once (unaligned
    sublane slices are the expensive part), then each 3x3 tap is a cheap
    major-dim row slice of those views.  Accumulation is row-striped so the
    live f32 accumulator stays small instead of one whole (Ho,Wo,C) buffer."""
    s = stride
    w = w_ref[...]                 # (9, TC) f32
    scale = s_ref[...]             # (1, TC)
    shift = t_ref[...]
    C = w.shape[-1]

    cols = {}
    for dy in range(3):
        for dx in range(3):
            p = (dy % s) * s + (dx % s)
            c0 = dx // s
            if (p, c0) not in cols:
                cols[(p, c0)] = ph_ref[p, :, c0:c0 + Wo, :]   # (Hph, Wo, TC) bf16

    for r_lo in range(0, Ho, row_tile):
        tr = min(row_tile, Ho - r_lo)
        acc = jnp.zeros((tr, Wo, C), jnp.float32)
        for dy in range(3):
            for dx in range(3):
                p = (dy % s) * s + (dx % s)
                r0, c0 = dy // s, dx // s
                tap = cols[(p, c0)][r0 + r_lo:r0 + r_lo + tr]  # value row slice
                acc = acc + tap.astype(jnp.float32) * w[dy * 3 + dx]
        y = jnp.maximum(acc * scale + shift, 0.0)
        o_ref[0, r_lo:r_lo + tr] = y.astype(o_ref.dtype)


def dwconv3x3_forward(x, p, stride):
    N, H, W, C = x.shape
    ph, Ho, Wo, Hph, Wph = _phase_split(x, stride)
    s2 = stride * stride
    TC = 128 if (C % 128 == 0) else C          # channel tiling (extra parallel work, bounded VMEM)
    row_tile = min(Ho, 8)
    grid = (N, C // TC)
    return pl.pallas_call(
        functools.partial(_dw_kernel, stride=stride, Ho=Ho, Wo=Wo, row_tile=row_tile),
        out_shape=jax.ShapeDtypeStruct((N, Ho, Wo, C), ACT_DTYPE),
        grid=grid,
        in_specs=[
            pl.BlockSpec((s2, Hph, Wph, TC), lambda n, c: (n, 0, 0, c)),
            pl.BlockSpec((9, TC), lambda n, c: (0, c)),
            pl.BlockSpec((1, TC), lambda n, c: (0, c)),
            pl.BlockSpec((1, TC), lambda n, c: (0, c)),
        ],
        out_specs=pl.BlockSpec((1, Ho, Wo, TC), lambda n, c: (n, 0, 0, c)),
        compiler_params=pltpu.CompilerParams(
            dimension_semantics=("parallel", "parallel"),
            vmem_limit_bytes=_vmem_limit()),
    )(ph, p["w"], p["scale"].reshape(1, C), p["shift"].reshape(1, C))


# ----------------------------- fused Pw2 + global-average-pool -----------------------------

def _pw2_gap_kernel(x_ref, w_ref, s_ref, t_ref, y_ref, gap_ref, *, inv_hw, hw, thw):
    t = pl.program_id(1)

    @pl.when(t == 0)
    def _():
        gap_ref[...] = jnp.zeros_like(gap_ref)

    y = jnp.dot(x_ref[0], w_ref[...], preferred_element_type=jnp.float32)
    y = jnp.maximum(y * s_ref[...] + t_ref[...], 0.0)
    y_ref[0] = y.astype(y_ref.dtype)
    if hw % thw:   # mask out-of-range rows so they never pollute the pool
        rows = jax.lax.broadcasted_iota(jnp.int32, y.shape, 0) + t * thw
        y = jnp.where(rows < hw, y, 0.0)
    gap_ref[...] += jnp.sum(y, axis=0, keepdims=True) * inv_hw


def pw2_with_gap(x, p):
    """x:(N,HW,Cin) bf16 -> (relu(bn(x@w)):(N,HW,Cout) bf16, mean over HW:(N,Cout) f32)."""
    N, HW, Cin = x.shape
    Cout = p["w"].shape[1]
    THW = _row_tile(HW)
    grid = (N, pl.cdiv(HW, THW))
    y, gap = pl.pallas_call(
        functools.partial(_pw2_gap_kernel, inv_hw=1.0 / HW, hw=HW, thw=THW),
        out_shape=(jax.ShapeDtypeStruct((N, HW, Cout), ACT_DTYPE),
                   jax.ShapeDtypeStruct((N, Cout), jnp.float32)),
        grid=grid,
        in_specs=[
            pl.BlockSpec((1, THW, Cin), lambda n, t: (n, t, 0)),
            pl.BlockSpec((Cin, Cout), lambda n, t: (0, 0)),     # weight VMEM-resident
            pl.BlockSpec((1, Cout), lambda n, t: (0, 0)),
            pl.BlockSpec((1, Cout), lambda n, t: (0, 0)),
        ],
        out_specs=[pl.BlockSpec((1, THW, Cout), lambda n, t: (n, t, 0)),
                   pl.BlockSpec((1, Cout), lambda n, t: (n, 0))],
        compiler_params=pltpu.CompilerParams(
            dimension_semantics=("parallel", "arbitrary"),
            vmem_limit_bytes=_vmem_limit()),
    )(x, p["w"], p["scale"].reshape(1, Cout), p["shift"].reshape(1, Cout))
    return y, gap


# ----------------------------- fused SE gating + residual (+ PwR projection) -----------------------------

def _se_add_kernel(y_ref, g_ref, r_ref, o_ref):
    o_ref[0] = (y_ref[0] * g_ref[...] + r_ref[0]).astype(o_ref.dtype)


def _se_proj_add_kernel(y_ref, g_ref, r_ref, w_ref, s_ref, t_ref, o_ref):
    # TODO(synk): PwR shortcut assumed BN+ReLU (conv1x1_block defaults); verify.
    r = jnp.dot(r_ref[0], w_ref[...], preferred_element_type=jnp.float32)
    r = jnp.maximum(r * s_ref[...] + t_ref[...], 0.0)
    o_ref[0] = (y_ref[0] * g_ref[...] + r).astype(o_ref.dtype)


def se_residual(y, gate, residual, proj=None):
    """out = y * gate + R, where R = residual (identity) or relu(bn(residual @ Wr))."""
    N, HW, Cout = y.shape
    THW = _row_tile(HW)
    grid = (N, pl.cdiv(HW, THW))
    cp = pltpu.CompilerParams(dimension_semantics=("parallel", "parallel"),
                              vmem_limit_bytes=_vmem_limit())
    y_spec = pl.BlockSpec((1, THW, Cout), lambda n, t: (n, t, 0))
    g_spec = pl.BlockSpec((1, Cout), lambda n, t: (n, 0))
    o_spec = pl.BlockSpec((1, THW, Cout), lambda n, t: (n, t, 0))
    if proj is None:
        r_spec = pl.BlockSpec((1, THW, Cout), lambda n, t: (n, t, 0))
        return pl.pallas_call(
            _se_add_kernel,
            out_shape=jax.ShapeDtypeStruct((N, HW, Cout), ACT_DTYPE),
            grid=grid, in_specs=[y_spec, g_spec, r_spec], out_specs=o_spec,
            compiler_params=cp,
        )(y, gate, residual)
    Cin = residual.shape[-1]
    r_spec = pl.BlockSpec((1, THW, Cin), lambda n, t: (n, t, 0))
    w_spec = pl.BlockSpec((Cin, Cout), lambda n, t: (0, 0))
    v_spec = pl.BlockSpec((1, Cout), lambda n, t: (0, 0))
    return pl.pallas_call(
        _se_proj_add_kernel,
        out_shape=jax.ShapeDtypeStruct((N, HW, Cout), ACT_DTYPE),
        grid=grid,
        in_specs=[y_spec, g_spec, r_spec, w_spec, v_spec, v_spec],
        out_specs=o_spec, compiler_params=cp,
    )(y, gate, residual, proj["w"], proj["scale"].reshape(1, Cout),
      proj["shift"].reshape(1, Cout))


# ----------------------------- fused final conv + global pool -----------------------------

def _conv_gap_kernel(x_ref, w_ref, s_ref, t_ref, gap_ref, *, inv_hw, hw, thw):
    t = pl.program_id(1)

    @pl.when(t == 0)
    def _():
        gap_ref[...] = jnp.zeros_like(gap_ref)

    y = jnp.dot(x_ref[0], w_ref[...], preferred_element_type=jnp.float32)
    y = jnp.maximum(y * s_ref[...] + t_ref[...], 0.0)
    if hw % thw:
        rows = jax.lax.broadcasted_iota(jnp.int32, y.shape, 0) + t * thw
        y = jnp.where(rows < hw, y, 0.0)
    gap_ref[...] += jnp.sum(y, axis=0, keepdims=True) * inv_hw


def final_conv_gap(x, p):
    """GAP(relu(bn(x @ w))) without ever writing the (N,HW,1024) feature map.
    The full (Cin,1024) bf16 weight stays VMEM-resident (single N tile)."""
    N, HW, Cin = x.shape
    Cout = p["w"].shape[1]
    THW = _row_tile(HW)
    grid = (N, pl.cdiv(HW, THW))
    return pl.pallas_call(
        functools.partial(_conv_gap_kernel, inv_hw=1.0 / HW, hw=HW, thw=THW),
        out_shape=jax.ShapeDtypeStruct((N, Cout), jnp.float32),
        grid=grid,
        in_specs=[
            pl.BlockSpec((1, THW, Cin), lambda n, t: (n, t, 0)),
            pl.BlockSpec((Cin, Cout), lambda n, t: (0, 0)),
            pl.BlockSpec((1, Cout), lambda n, t: (0, 0)),
            pl.BlockSpec((1, Cout), lambda n, t: (0, 0)),
        ],
        out_specs=pl.BlockSpec((1, Cout), lambda n, t: (n, 0)),
        compiler_params=pltpu.CompilerParams(
            dimension_semantics=("parallel", "arbitrary"),
            vmem_limit_bytes=_vmem_limit()),
    )(x, p["w"], p["scale"].reshape(1, Cout), p["shift"].reshape(1, Cout))


# ----------------------------- init 3x3 conv (im2col, cheap: cin=3) -----------------------------

def _extract_patches(x, stride):
    N, H, W, C = x.shape
    Ho = (H - 1) // stride + 1
    Wo = (W - 1) // stride + 1
    xp = jnp.pad(x, ((0, 0), (1, 1), (1, 1), (0, 0)))
    taps = []
    for dy in range(3):
        for dx in range(3):
            taps.append(xp[:, dy:dy + (Ho - 1) * stride + 1:stride,
                           dx:dx + (Wo - 1) * stride + 1:stride, :])
    return jnp.stack(taps, axis=0), Ho, Wo


def conv3x3_forward(x, p, stride, act):
    N, H, W, C = x.shape
    patches, Ho, Wo = _extract_patches(x, stride)                    # (9,N,Ho,Wo,C)
    pr = jnp.transpose(patches, (1, 2, 3, 0, 4)).reshape(N * Ho * Wo, 9 * C)
    cout = p["w"].shape[1]
    y = matmul_act(pr, p["w"], p["scale"], p["shift"], act)
    return y.reshape(N, Ho, Wo, cout)


# ----------------------------- parameter setup -----------------------------

def _kaiming_uniform(key, shape, fan_in, dtype=jnp.float32):
    bound = (6.0 / fan_in) ** 0.5
    return jax.random.uniform(key, shape, jnp.float32, -bound, bound).astype(dtype)


def _bn_affine(key, c, eps=1e-5):
    k1, k2, k3, k4 = jax.random.split(key, 4)
    gamma = jax.random.uniform(k1, (c,), jnp.float32, 0.5, 1.5)
    beta = jax.random.uniform(k2, (c,), jnp.float32, -0.1, 0.1)
    mean = jax.random.uniform(k3, (c,), jnp.float32, -0.1, 0.1)
    var = jax.random.uniform(k4, (c,), jnp.float32, 0.5, 1.5)
    scale = gamma / jnp.sqrt(var + eps)
    shift = beta - mean * scale
    return scale, shift


def _conv1x1_params(key, cin, cout, use_bn=True):
    kw, kb = jax.random.split(key)
    w = _kaiming_uniform(kw, (cin, cout), cin, jnp.bfloat16)     # MXU weights in bf16
    if use_bn:
        scale, shift = _bn_affine(kb, cout)
        return dict(w=w, scale=scale, shift=shift)
    return dict(w=w, scale=None, shift=None)


def _conv3x3_params(key, cin, cout):
    kw, kb = jax.random.split(key)
    w = _kaiming_uniform(kw, (9 * cin, cout), 9 * cin, jnp.bfloat16)
    scale, shift = _bn_affine(kb, cout)
    return dict(w=w, scale=scale, shift=shift)


def _dw3x3_params(key, c):
    kw, kb = jax.random.split(key)
    w = _kaiming_uniform(kw, (9, c), 9)                          # VPU path stays f32
    scale, shift = _bn_affine(kb, c)
    return dict(w=w, scale=scale, shift=shift)


def _se_params(key, c, reduction=16):
    k1, k2 = jax.random.split(key)
    cr = max(c // reduction, 1)
    return dict(w1=_kaiming_uniform(k1, (c, cr), c),
                w2=_kaiming_uniform(k2, (cr, c), cr))


def _fr_pdp_params(key, cin, cout, stride):
    ks = jax.random.split(key, 5)
    return dict(stride=stride, cin=cin, cout=cout,
                Pw1=_conv1x1_params(ks[0], cin, cin, use_bn=False),
                Dw=_dw3x3_params(ks[1], cin),
                Pw2=_conv1x1_params(ks[2], cin, cout),
                PwR=_conv1x1_params(ks[3], cin, cout),
                SE=_se_params(ks[4], cout))


def build_params(key, num_classes, in_channels, init_conv_channels, init_conv_stride,
                 channels, strides):
    keys = jax.random.split(key, 8)
    data_scale, data_shift = _bn_affine(keys[0], in_channels)
    params = dict(
        init_conv_stride=init_conv_stride,
        data_bn=dict(scale=data_scale, shift=data_shift),
        init_conv=_conv3x3_params(keys[1], in_channels, init_conv_channels),
    )
    blocks = []
    cin = init_conv_channels
    bkey = keys[2]
    for sid, stage_channels in enumerate(channels):
        for uid, cout in enumerate(stage_channels):
            stride = strides[sid] if uid == 0 else 1
            bkey, sub = jax.random.split(bkey)
            blocks.append(_fr_pdp_params(sub, cin, cout, stride))
            cin = cout
    params["blocks"] = blocks
    params["final_conv"] = _conv1x1_params(keys[3], cin, 1024)
    kcw, _ = jax.random.split(keys[4])
    params["classifier"] = dict(w=_kaiming_uniform(kcw, (1024, num_classes), 1024),
                                b=jnp.zeros((num_classes,), jnp.float32))
    return params


# ----------------------------- forward pass -----------------------------

def fr_pdp_forward(x, p):
    N, H, W, cin = x.shape
    cout, stride = p["cout"], p["stride"]

    # Pw1: 1x1 conv, no BN, no activation (identity epilogue skipped)
    y = matmul_act(x.reshape(N * H * W, cin), p["Pw1"]["w"],
                   act="none").reshape(N, H, W, cin)
    # Dw: depthwise 3x3 (stride) + BN + ReLU, taps formed in-kernel
    y = dwconv3x3_forward(y, p["Dw"], stride)
    _, Ho, Wo, _ = y.shape
    HW = Ho * Wo

    # Pw2 (1x1 -> cout, BN + ReLU) fused with the SE global-average-pool
    y2, gap = pw2_with_gap(y.reshape(N, HW, cin), p["Pw2"])

    # SE FC layers: tiny matmuls -> plain XLA (launch overhead > compute)
    h = jax.nn.relu(jnp.dot(gap, p["SE"]["w1"]))
    gate = jax.nn.sigmoid(jnp.dot(h, p["SE"]["w2"]))                 # (N, cout) f32

    # SE gating + residual add (with fused PwR 1x1 projection when needed)
    if stride == 1 and cin == cout:
        out = se_residual(y2, gate, x.reshape(N, HW, cout))
    else:
        rsub = x[:, ::stride, ::stride, :].reshape(N, HW, cin)       # stride-s 1x1 sampling
        out = se_residual(y2, gate, rsub, proj=p["PwR"])
    return out.reshape(N, Ho, Wo, cout)


def ticknet_forward(x_nchw, P):
    N, C, H, W = x_nchw.shape
    x = jnp.transpose(x_nchw, (0, 2, 3, 1)).astype(jnp.float32)      # NCHW -> NHWC
    # data BatchNorm (inference mode) as a per-channel affine; left to XLA so it
    # fuses with the im2col padding below (avoids an extra HBM pass / kernel).
    x = x * P["data_bn"]["scale"] + P["data_bn"]["shift"]
    x = x.astype(ACT_DTYPE)                                          # activations live in bf16
    # init 3x3 conv + BN + ReLU
    x = conv3x3_forward(x, P["init_conv"], stride=P["init_conv_stride"], act="relu")
    # FR_PDP stages
    for blk in P["blocks"]:
        x = fr_pdp_forward(x, blk)
    # final 1x1 conv -> 1024, BN + ReLU, fused with AdaptiveAvgPool2d(1)
    N2, Hf, Wf, Cf = x.shape
    pooled = final_conv_gap(x.reshape(N2, Hf * Wf, Cf), P["final_conv"])  # (N, 1024) f32
    # classifier: 1x1 conv with bias on a (N, 1024) tensor -> plain XLA
    logits = jnp.dot(pooled, P["classifier"]["w"]) + P["classifier"]["b"]
    return logits                                                    # (N, num_classes)


# ----------------------------- main -----------------------------

if __name__ == "__main__":
    key = jax.random.PRNGKey(0)
    kx, kp = jax.random.split(key)

    # Small TickNet config (same structure as the PyTorch module, scaled down)
    num_classes = 10
    in_channels = 3
    init_conv_channels = 16
    init_conv_stride = 2
    channels = [[32], [48]]
    strides = [1, 2]

    x = jax.random.normal(kx, (2, in_channels, 16, 16), jnp.float32)  # NCHW like PyTorch
    params = build_params(kp, num_classes, in_channels, init_conv_channels,
                          init_conv_stride, channels, strides)

    logits = ticknet_forward(x, params)
    logits = jax.block_until_ready(logits)
    assert logits.shape == (2, num_classes)
    assert bool(jnp.all(jnp.isfinite(logits)))
    print("KERNEL_OK")
</pallas_src>

<mosaic_0001>
module attributes {stable_mosaic.version = 11 : i64} {
  func.func @_mm_affine_kernel(%arg0: i32, %arg1: memref<128x27xbf16, #tpu.memory_space<vmem>>, %arg2: memref<27x16xbf16, #tpu.memory_space<vmem>>, %arg3: memref<1x16xf32, #tpu.memory_space<vmem>>, %arg4: memref<1x16xf32, #tpu.memory_space<vmem>>, %arg5: memref<128x16xbf16, #tpu.memory_space<vmem>>) attributes {dimension_semantics = [#tpu.dimension_semantics<parallel>], iteration_bounds = array<i64: 1>, scalar_prefetch = 0 : i64, scratch_operands = 0 : i64, tpu.core_type = #tpu.core_type<tc>, window_params = [{transform_indices = @transform_0, window_bounds = array<i64: 128, 27>}, {pipeline_mode = #tpu.pipeline_mode<synchronous>, transform_indices = @transform_1, window_bounds = array<i64: 27, 16>}, {pipeline_mode = #tpu.pipeline_mode<synchronous>, transform_indices = @transform_2, window_bounds = array<i64: 1, 16>}, {pipeline_mode = #tpu.pipeline_mode<synchronous>, transform_indices = @transform_3, window_bounds = array<i64: 1, 16>}, {transform_indices = @transform_4, window_bounds = array<i64: 128, 16>}]} {
    %c0 = arith.constant 0 : index
    %c0_0 = arith.constant 0 : index
    %0 = vector.load %arg1[%c0, %c0_0] : memref<128x27xbf16, #tpu.memory_space<vmem>>, vector<128x27xbf16>
    %c0_1 = arith.constant 0 : index
    %c0_2 = arith.constant 0 : index
    %1 = vector.load %arg2[%c0_1, %c0_2] : memref<27x16xbf16, #tpu.memory_space<vmem>>, vector<27x16xbf16>
    %cst = arith.constant dense<0.000000e+00> : vector<128x16xf32>
    %2 = tpu.matmul %0, %1, %cst {dimension_numbers = #tpu.dot_dimension_numbers<[1], [0], [0], [1], [0, 0, 1, 1], [], []>} : vector<128x27xbf16>, vector<27x16xbf16>, vector<128x16xf32> -> vector<128x16xf32>
    %c0_3 = arith.constant 0 : index
    %c0_4 = arith.constant 0 : index
    %3 = vector.load %arg3[%c0_3, %c0_4] : memref<1x16xf32, #tpu.memory_space<vmem>>, vector<1x16xf32>
    %4 = vector.broadcast %3 : vector<1x16xf32> to vector<128x16xf32>
    %5 = arith.mulf %2, %4 : vector<128x16xf32>
    %c0_5 = arith.constant 0 : index
    %c0_6 = arith.constant 0 : index
    %6 = vector.load %arg4[%c0_5, %c0_6] : memref<1x16xf32, #tpu.memory_space<vmem>>, vector<1x16xf32>
    %7 = vector.broadcast %6 : vector<1x16xf32> to vector<128x16xf32>
    %8 = arith.addf %5, %7 : vector<128x16xf32>
    %cst_7 = arith.constant 0.000000e+00 : f32
    %9 = vector.broadcast %cst_7 : f32 to vector<128x16xf32>
    %10 = arith.maximumf %8, %9 : vector<128x16xf32>
    %11 = arith.truncf %10 : vector<128x16xf32> to vector<128x16xbf16>
    %c0_8 = arith.constant 0 : index
    %c0_9 = arith.constant 0 : index
    %12 = vector.load %arg5[%c0_8, %c0_9] : memref<128x16xbf16, #tpu.memory_space<vmem>>, vector<128x16xbf16>
    tpu.vector_store %arg5[%c0_8, %c0_9], %11 {strides = array<i32>} : memref<128x16xbf16, #tpu.memory_space<vmem>>, vector<128x16xbf16>,
    return
  }
  func.func @transform_0(%arg0: i32) -> (i32, i32) {
    %c0_i32 = arith.constant 0 : i32
    %c0_i32_0 = arith.constant 0 : i32
    return %arg0, %c0_i32 : i32, i32
  }
  func.func @transform_1(%arg0: i32) -> (i32, i32) {
    %c0_i32 = arith.constant 0 : i32
    %c0_i32_0 = arith.constant 0 : i32
    %c0_i32_1 = arith.constant 0 : i32
    return %c0_i32, %c0_i32_0 : i32, i32
  }
  func.func @transform_2(%arg0: i32) -> (i32, i32) {
    %c0_i32 = arith.constant 0 : i32
    %c0_i32_0 = arith.constant 0 : i32
    %c0_i32_1 = arith.constant 0 : i32
    return %c0_i32, %c0_i32_0 : i32, i32
  }
  func.func @transform_3(%arg0: i32) -> (i32, i32) {
    %c0_i32 = arith.constant 0 : i32
    %c0_i32_0 = arith.constant 0 : i32
    %c0_i32_1 = arith.constant 0 : i32
    return %c0_i32, %c0_i32_0 : i32, i32
  }
  func.func @transform_4(%arg0: i32) -> (i32, i32) {
    %c0_i32 = arith.constant 0 : i32
    %c0_i32_0 = arith.constant 0 : i32
    return %arg0, %c0_i32 : i32, i32
  }
}

</mosaic_0001>

<bundles_post_ra>
// kernel: tpu_custom_call.1
= control target key start
LH: loop header
LB: loop body
LE: loop exit
PB: predicated region body
PF: predicated region fallthrough
CT: control target
= control target key end

     0   :  { %vm114_vm0 = vcmask 1044480   ;;  %vm115_vm1 = vcmask 1045504   ;;  %v462_v1 = vmov 65535   ;;  %vm89_vm2 = vcmask 220160   ;;  %s632_s1 = inlined_call_operand.vmem [shape: bf16[27,16], index: 1, kind: input, shape index: {}]   ;;  %s633_s0 = inlined_call_operand.vmem [shape: bf16[128,27], index: 0, kind: input, shape index: {}]   ;;  %s634_s2 = inlined_call_operand.vmem [shape: f32[1,16], index: 2, kind: input, shape index: {}]   ;;  %s635_s3 = inlined_call_operand.vmem [shape: f32[1,16], index: 3, kind: input, shape index: {}]   ;;  %s636_s4 = inlined_call_operand.vmem [shape: bf16[128,16], index: 4, kind: output, shape index: {}]  }
   0x1   :  { %v452_v0 = vld [vmem:[%s632_s1 + $0x8] sm:$0x3f]   ;;  %v116_v2 = vsel %vm114_vm0, 4294967295, %v462_v1  ;;  %v454_v4 = vld [vmem:[%s633_s0] sm:$0xff]   ;;  %v458_v10 = vld [vmem:[%s633_s0 + $0x10] sm:$0xff]   ;;  %vm344_vm3 = vcmask 125952  }
   0x2   :  { %v117_v3 = vsel %vm115_vm1, %v116_v2, 0  ;;  %v453_v6 = vld [vmem:[%s632_s1] sm:$0xff]   ;;  %431 = vmatprep.mubr.msk.bf16.mxu0 %vm89_vm2, %v454_v4  ;;  %v456_v8 = vld [vmem:[%s633_s0 + $0x8] sm:$0xff]   ;;  %v459_v11 = vld [vmem:[%s633_s0 + $0x30] sm:$0xff]  }
   0x3   :  { %v119_v5 = vand.u32 %v452_v0, %v117_v3  ;;  %v455_v7 = vld [vmem:[%s633_s0 + $0x20] sm:$0xff]   ;;  %v457_v9 = vld [vmem:[%s633_s0 + $0x28] sm:$0xff]   ;;  %v460_v12 = vld [vmem:[%s633_s0 + $0x18] sm:$0xff]  }
   0x4   :  { %439 = vmatprep.mubr.msk.bf16.mxu1 %vm89_vm2, %v455_v7  ;;  %v461_v13 = vld [vmem:[%s633_s0 + $0x38] sm:$0xff]   ;;  %v529_v14 = vld [vmem:[%s634_s2] ss:$0 sm:$0xff] }
   0x5   :  { %427 = vmatprep.subr.bf16.mxu0 %v119_v5  ;;  %447 = vmatprep.subr.bf16.mxu1 %v119_v5  ;;  %v534_v16 = vld [vmem:[%s635_s3] ss:$0 sm:$0xff] }
   0x6   :  { %428 = vmatpush3.bf16.msra.mxu0 %v119_v5  ;;  %449 = vmatpush3.bf16.msra.mxu1 %v119_v5 }
   0x7   :  { %429 = vmatprep.subr.bf16.mxu0 %v453_v6  ;;  %448 = vmatprep.subr.bf16.mxu1 %v453_v6 }
   0xa   :  { %430 = vmatpush3.bf16.msra.mxu0 %v453_v6  ;;  %450 = vmatpush3.bf16.msra.mxu1 %v453_v6 }
   0xd   :  { %432 = vmatmul.mubr.msk.bf16.vlgmr.msra.gmra.mxu0 %vm89_vm2, %v456_v8  ;;  %440 = vmatmul.mubr.msk.bf16.vlgmr.msra.gmra.mxu1 %vm89_vm2, %v457_v9 }
   0xe   :  { %435 = vmatprep.mubr.msk.bf16.mxu0 %vm89_vm2, %v458_v10  ;;  %443 = vmatprep.mubr.msk.bf16.mxu1 %vm89_vm2, %v459_v11 }
  0x15   :  { %436 = vmatmul.mubr.msk.bf16.gmra.mxu0 %vm89_vm2, %v460_v12  ;;  %444 = vmatmul.mubr.msk.bf16.gmra.mxu1 %vm89_vm2, %v461_v13 }
  0xcd   :  { %v433_v15 = vpop.f32.mrf.mxu0  ;;  %v441_v17 = vpop.f32.mrf.mxu1 }
  0xce   :  { %v227_v18 = vmul.f32 %v433_v15, %v529_v14  ;;  %v235_v19 = vmul.f32 %v441_v17, %v529_v14 }
  0xcf   :  { %v155_v20 = vpop.f32.mrf.mxu0  ;;  %v187_v21 = vpop.f32.mrf.mxu1 }
  0xd0   :  { %v250_v22 = vadd.f32 %v534_v16, %v227_v18  ;;  %v258_v23 = vadd.f32 %v534_v16, %v235_v19  ;;  %v225_v24 = vmul.f32 %v529_v14, %v155_v20  ;;  %v233_v25 = vmul.f32 %v529_v14, %v187_v21 }
  0xd1   :  { %v434_v26 = vpop.f32.mrf.mxu0  ;;  %v442_v27 = vpop.f32.mrf.mxu1 }
  0xd2   :  { %v266_v28 = vmax.f32 %v250_v22, 0.0  ;;  %v274_v29 = vmax.f32 %v258_v23, 0.0  ;;  %v248_v30 = vadd.f32 %v534_v16, %v225_v24  ;;  %v256_v31 = vadd.f32 %v534_v16, %v233_v25 }
  0xd3   :  { %v228_v32 = vmul.f32 %v434_v26, %v529_v14  ;;  %v236_v33 = vmul.f32 %v442_v27, %v529_v14  ;;  %v158_v34 = vpop.f32.mrf.mxu0  ;;  %v190_v35 = vpop.f32.mrf.mxu1 }
  0xd4   :  { %v403_v36 = vpack.c.bf16 %v266_v28, %v266_v28  ;;  %v411_v37 = vpack.c.bf16 %v274_v29, %v274_v29  ;;  %v264_v38 = vmax.f32 %v248_v30, 0.0  ;;  %v272_v39 = vmax.f32 %v256_v31, 0.0 }
  0xd5   :  { %v251_v40 = vadd.f32 %v534_v16, %v228_v32  ;;  %v259_v41 = vadd.f32 %v534_v16, %v236_v33  ;;  %v226_v42 = vmul.f32 %v529_v14, %v158_v34  ;;  %v234_v43 = vmul.f32 %v529_v14, %v190_v35  ;;  %v437_v44 = vpop.f32.mrf.mxu0  ;;  %v445_v45 = vpop.f32.mrf.mxu1 }
  0xd6   :  { %347 = vst.msk [vmem:[%s636_s4 + $0x8] sm:$0xf] %vm344_vm3, %v403_v36  ;;  %355 = vst.msk [vmem:[%s636_s4 + $0x28] sm:$0xf] %vm344_vm3, %v411_v37  ;;  %v401_v46 = vpack.c.bf16 %v264_v38, %v264_v38  ;;  %v409_v47 = vpack.c.bf16 %v272_v39, %v272_v39  ;;  %v231_v48 = vmul.f32 %v437_v44, %v529_v14 }
  0xd7   :  { %v239_v49 = vmul.f32 %v445_v45, %v529_v14  ;;  %v267_v50 = vmax.f32 %v251_v40, 0.0  ;;  %v275_v51 = vmax.f32 %v259_v41, 0.0  ;;  %v249_v52 = vadd.f32 %v534_v16, %v226_v42  ;;  %v171_v54 = vpop.f32.mrf.mxu0  ;;  %v203_v55 = vpop.f32.mrf.mxu1 }
  0xd8   :  { %v257_v53 = vadd.f32 %v534_v16, %v234_v43  ;;  %345 = vst.msk [vmem:[%s636_s4] sm:$0xf] %vm344_vm3, %v401_v46  ;;  %353 = vst.msk [vmem:[%s636_s4 + $0x20] sm:$0xf] %vm344_vm3, %v409_v47  ;;  %v254_v56 = vadd.f32 %v534_v16, %v231_v48  ;;  %v229_v58 = vmul.f32 %v529_v14, %v171_v54 }
  0xd9   :  { %v262_v57 = vadd.f32 %v534_v16, %v239_v49  ;;  %v237_v59 = vmul.f32 %v529_v14, %v203_v55  ;;  %v404_v60 = vpack.c.bf16 %v267_v50, %v267_v50  ;;  %v412_v61 = vpack.c.bf16 %v275_v51, %v275_v51  ;;  %v438_v0 = vpop.f32.mrf.mxu0  ;;  %v446_v1 = vpop.f32.mrf.mxu1 }
  0xda   :  { %v265_v62 = vmax.f32 %v249_v52, 0.0  ;;  %v273_v63 = vmax.f32 %v257_v53, 0.0  ;;  %v270_v2 = vmax.f32 %v254_v56, 0.0  ;;  %v252_v4 = vadd.f32 %v534_v16, %v229_v58 }
  0xdb   :  { %v278_v3 = vmax.f32 %v262_v57, 0.0  ;;  %v260_v5 = vadd.f32 %v534_v16, %v237_v59  ;;  %348 = vst.msk [vmem:[%s636_s4 + $0xc] sm:$0xf] %vm344_vm3, %v404_v60  ;;  %356 = vst.msk [vmem:[%s636_s4 + $0x2c] sm:$0xf] %vm344_vm3, %v412_v61  ;;  %v232_v8 = vmul.f32 %v438_v0, %v529_v14  ;;  %v240_v9 = vmul.f32 %v446_v1, %v529_v14  ;;  %v174_v10 = vpop.f32.mrf.mxu0  ;;  %v206_v11 = vpop.f32.mrf.mxu1 }
  0xdc   :  { %v402_v6 = vpack.c.bf16 %v265_v62, %v265_v62  ;;  %v410_v7 = vpack.c.bf16 %v273_v63, %v273_v63  ;;  %v407_v12 = vpack.c.bf16 %v270_v2, %v270_v2  ;;  %v268_v15 = vmax.f32 %v252_v4, 0.0 }
  0xdd   :  { %v415_v13 = vpack.c.bf16 %v278_v3, %v278_v3  ;;  %v276_v17 = vmax.f32 %v260_v5, 0.0  ;;  %v255_v18 = vadd.f32 %v534_v16, %v232_v8  ;;  %v263_v19 = vadd.f32 %v534_v16, %v240_v9 }
  0xde   :  { %346 = vst.msk [vmem:[%s636_s4 + $0x4] sm:$0xf] %vm344_vm3, %v402_v6  ;;  %354 = vst.msk [vmem:[%s636_s4 + $0x24] sm:$0xf] %vm344_vm3, %v410_v7  ;;  %v230_v20 = vmul.f32 %v529_v14, %v174_v10  ;;  %v238_v21 = vmul.f32 %v529_v14, %v206_v11  ;;  %v405_v22 = vpack.c.bf16 %v268_v15, %v268_v15 }
  0xdf   :  { %351 = vst.msk [vmem:[%s636_s4 + $0x18] sm:$0xf] %vm344_vm3, %v407_v12  ;;  %359 = vst.msk [vmem:[%s636_s4 + $0x38] sm:$0xf] %vm344_vm3, %v415_v13  ;;  %v413_v23 = vpack.c.bf16 %v276_v17, %v276_v17  ;;  %v271_v24 = vmax.f32 %v255_v18, 0.0  ;;  %v279_v25 = vmax.f32 %v263_v19, 0.0 }
  0xe0   :  { %v253_v26 = vadd.f32 %v534_v16, %v230_v20  ;;  %v261_v27 = vadd.f32 %v534_v16, %v238_v21  ;;  %349 = vst.msk [vmem:[%s636_s4 + $0x10] sm:$0xf] %vm344_vm3, %v405_v22 }
  0xe1   :  { %357 = vst.msk [vmem:[%s636_s4 + $0x30] sm:$0xf] %vm344_vm3, %v413_v23  ;;  %v408_v14 = vpack.c.bf16 %v271_v24, %v271_v24  ;;  %v416_v28 = vpack.c.bf16 %v279_v25, %v279_v25 }
  0xe2   :  { %v269_v29 = vmax.f32 %v253_v26, 0.0  ;;  %v277_v30 = vmax.f32 %v261_v27, 0.0 }
  0xe3   :  { %352 = vst.msk [vmem:[%s636_s4 + $0x1c] sm:$0xf] %vm344_vm3, %v408_v14  ;;  %360 = vst.msk [vmem:[%s636_s4 + $0x3c] sm:$0xf] %vm344_vm3, %v416_v28 }
  0xe4   :  { %v406_v16 = vpack.c.bf16 %v269_v29, %v269_v29  ;;  %v414_v31 = vpack.c.bf16 %v277_v30, %v277_v30 }
  0xe6   :  { %350 = vst.msk [vmem:[%s636_s4 + $0x14] sm:$0xf] %vm344_vm3, %v406_v16  ;;  %358 = vst.msk [vmem:[%s636_s4 + $0x34] sm:$0xf] %vm344_vm3, %v414_v31 }

</bundles_post_ra>
